<compile_context>
chip_gen: v5e
topology: v5e:2x2
jax: 0.10.0
libtpu: 0.0.40
codegen_flags: <defaults>
</compile_context>

<pallas_src>
import functools

import jax
import jax.numpy as jnp
from jax.experimental import pallas as pl
from jax.experimental.pallas import tpu as pltpu


def _sepconv_kernel(x_ref, wd_ref, wp_ref, out_ref, *,
                    k, h_tile, w_out, c_in, c_out, dot_dtype):
    """One (batch, row-block) tile of depthwise(kxk) + pointwise(1x1) conv.

    x_ref  : (h_tile + k - 1, w_out + k - 1, c_in)  padded input rows (+halo)  VMEM
    wd_ref : (k*k, 1, 1, c_in)  depthwise weights, tap-major (ky*k + kx)       VMEM
    wp_ref : (c_in, c_out)      pointwise weights                              VMEM
    out_ref: (h_tile * w_out, c_out)                                           VMEM
    """
    x = x_ref[...]
    wd = wd_ref[...]

    # Depthwise conv: k*k shifted fused multiply-adds on the VPU.  Slices of
    # the already-loaded value, accumulated in f32 registers.
    dw = x[0:h_tile, 0:w_out, :] * wd[0]
    for t in range(1, k * k):
        ky, kx = divmod(t, k)
        dw = dw + x[ky:ky + h_tile, kx:kx + w_out, :] * wd[t]

    # Pointwise 1x1 conv: a single MXU matmul per tile (K = c_in, N = c_out).
    lhs = dw.reshape(h_tile * w_out, c_in).astype(dot_dtype)
    y = jnp.dot(lhs, wp_ref[...].astype(dot_dtype),
                preferred_element_type=jnp.float32)
    out_ref[...] = y.astype(out_ref.dtype)


def _pick_h_tile(h_out, w_out, w_pad, c_in, c_out, k,
                 budget_bytes=8 * 1024 * 1024):
    """Largest divisor of h_out whose (input-with-halo + output) blocks stay
    under `budget_bytes`, so double-buffering comfortably fits VMEM on
    v5e/v6e (128 MiB) and v7x (64 MiB).  The output block's second-minor dim
    (h_tile * w_out) must be a multiple of 8 unless the block is the full
    output."""
    for h_tile in range(h_out, 0, -1):
        if h_out % h_tile:
            continue
        in_bytes = (h_tile + k - 1) * w_pad * c_in * 4
        out_bytes = h_tile * w_out * c_out * 4
        aligned = (h_tile * w_out) % 8 == 0 or h_tile == h_out
        if aligned and (in_bytes + out_bytes) <= budget_bytes:
            return h_tile
    return h_out


def separable_conv2d(x_nchw, w_depth, w_point, *, stride=1, padding=0,
                     dilation=1, h_tile=None, dot_dtype=jnp.float32):
    """Forward pass matching SeparableConv2d (bias=False).  NCHW in / NCHW out.

    w_depth: (Cin, 1, k, k)   PyTorch depthwise weight (groups=Cin)
    w_point: (Cout, Cin, 1, 1) PyTorch pointwise weight
    """
    assert stride == 1 and dilation == 1, "only stride=1, dilation=1 supported"
    N, Cin, H, W = x_nchw.shape
    assert w_depth.shape[0] == Cin and w_depth.shape[1] == 1
    k = w_depth.shape[2]
    assert w_depth.shape[3] == k
    Cout = w_point.shape[0]
    assert w_point.shape == (Cout, Cin, 1, 1)

    p = padding
    Hout = H + 2 * p - k + 1
    Wout = W + 2 * p - k + 1
    Wp = W + 2 * p
    assert Hout > 0 and Wout > 0
    halo = k - 1

    # ---- layout glue (XLA, done once): NCHW -> NHWC, zero pad, halo blocks
    x_nhwc = jnp.transpose(x_nchw, (0, 2, 3, 1)).astype(jnp.float32)
    xpad = jnp.pad(x_nhwc, ((0, 0), (p, p), (p, p), (0, 0)))

    if h_tile is None:
        h_tile = _pick_h_tile(Hout, Wout, Wp, Cin, Cout, k)
    assert Hout % h_tile == 0, (Hout, h_tile)
    HB = Hout // h_tile
    assert HB == 1 or (h_tile * Wout) % 8 == 0, "tile violates (8,128) rule"

    # Overlapping row blocks (halo duplicated once in HBM) so BlockSpecs stay
    # plain Blocked and the grid pipelines/double-buffers them.
    x_blocks = jnp.stack(
        [xpad[:, i * h_tile:i * h_tile + h_tile + halo] for i in range(HB)],
        axis=1)                                   # (N, HB, h_tile+halo, Wp, Cin)

    # Weights: (Cin,1,k,k) -> (k*k, 1, 1, Cin);  (Cout,Cin,1,1) -> (Cin, Cout)
    wd = jnp.transpose(w_depth.reshape(Cin, k * k), (1, 0))
    wd = wd.reshape(k * k, 1, 1, Cin).astype(jnp.float32)
    wp = jnp.transpose(w_point.reshape(Cout, Cin), (1, 0)).astype(jnp.float32)

    kernel = functools.partial(
        _sepconv_kernel, k=k, h_tile=h_tile, w_out=Wout,
        c_in=Cin, c_out=Cout, dot_dtype=dot_dtype)

    flops = 2 * N * Hout * Wout * (k * k * Cin + Cin * Cout)
    bytes_accessed = 4 * (x_blocks.size + wd.size + wp.size
                          + N * Hout * Wout * Cout)

    y = pl.pallas_call(
        kernel,
        out_shape=jax.ShapeDtypeStruct((N, Hout * Wout, Cout), jnp.float32),
        grid_spec=pltpu.PrefetchScalarGridSpec(
            num_scalar_prefetch=0,
            grid=(N, HB),
            in_specs=[
                # haloed input row block of image n
                pl.BlockSpec((None, None, h_tile + halo, Wp, Cin),
                             lambda n, hb: (n, hb, 0, 0, 0)),
                # weights: constant index_map -> loaded once, stay resident
                pl.BlockSpec((k * k, 1, 1, Cin), lambda n, hb: (0, 0, 0, 0)),
                pl.BlockSpec((Cin, Cout), lambda n, hb: (0, 0)),
            ],
            out_specs=pl.BlockSpec((None, h_tile * Wout, Cout),
                                   lambda n, hb: (n, hb, 0)),
        ),
        compiler_params=pltpu.CompilerParams(
            dimension_semantics=("parallel", "parallel"),
            vmem_limit_bytes=32 * 1024 * 1024,
        ),
        cost_estimate=pl.CostEstimate(flops=flops, transcendentals=0,
                                      bytes_accessed=bytes_accessed),
    )(x_blocks, wd, wp)

    # (N, Hout*Wout, Cout) -> (N, Cout, Hout, Wout)
    out = y.reshape(N, Hout, Wout, Cout)
    return jnp.transpose(out, (0, 3, 1, 2))


def reference_separable_conv2d(x_nchw, w_depth, w_point, *, padding=0):
    """Pure-JAX reference mirroring the PyTorch module semantics."""
    c_in = x_nchw.shape[1]
    dn = ("NCHW", "OIHW", "NCHW")
    dw = jax.lax.conv_general_dilated(
        x_nchw, w_depth, window_strides=(1, 1),
        padding=((padding, padding), (padding, padding)),
        dimension_numbers=dn, feature_group_count=c_in)
    return jax.lax.conv_general_dilated(
        dw, w_point, window_strides=(1, 1), padding=((0, 0), (0, 0)),
        dimension_numbers=dn)


if __name__ == "__main__":
    # SeparableConv2d(in_channels=4, out_channels=128, kernel_size=3, padding=1)
    # Cout = 128 keeps the output's lane dim a full 128-wide vreg (lane-dense
    # stores); h_tile=8 forces 2 row blocks per image so the tiled/pipelined
    # path is exercised even at this tiny demo size.
    N, Cin, H, W = 2, 4, 16, 16
    Cout, k, pad = 128, 3, 1

    key = jax.random.PRNGKey(0)
    k_x, k_d, k_p = jax.random.split(key, 3)
    x = jax.random.normal(k_x, (N, Cin, H, W), dtype=jnp.float32)
    w_depth = 0.2 * jax.random.normal(k_d, (Cin, 1, k, k), dtype=jnp.float32)
    w_point = 0.1 * jax.random.normal(k_p, (Cout, Cin, 1, 1), dtype=jnp.float32)

    out = separable_conv2d(x, w_depth, w_point, padding=pad, h_tile=8)
    out = jax.block_until_ready(out)

    ref = reference_separable_conv2d(x, w_depth, w_point, padding=pad)
    assert out.shape == (N, Cout, H, W), out.shape
    max_err = float(jnp.max(jnp.abs(out - ref)))
    assert jnp.allclose(out, ref, atol=1e-4, rtol=1e-4), max_err

    print("KERNEL_OK")
</pallas_src>

<mosaic_0001>
module attributes {stable_mosaic.version = 11 : i64} {
  func.func @_sepconv_kernel(%arg0: i32, %arg1: i32, %arg2: memref<1x1x10x18x4xf32, #tpu.memory_space<vmem>>, %arg3: memref<9x1x1x4xf32, #tpu.memory_space<vmem>>, %arg4: memref<4x128xf32, #tpu.memory_space<vmem>>, %arg5: memref<1x128x128xf32, #tpu.memory_space<vmem>>) attributes {dimension_semantics = [#tpu.dimension_semantics<parallel>, #tpu.dimension_semantics<parallel>], iteration_bounds = array<i64: 2, 2>, scalar_prefetch = 0 : i64, scratch_operands = 0 : i64, tpu.core_type = #tpu.core_type<tc>, window_params = [{transform_indices = @transform_0, window_bounds = array<i64: 1, 1, 10, 18, 4>}, {pipeline_mode = #tpu.pipeline_mode<synchronous>, transform_indices = @transform_1, window_bounds = array<i64: 9, 1, 1, 4>}, {pipeline_mode = #tpu.pipeline_mode<synchronous>, transform_indices = @transform_2, window_bounds = array<i64: 4, 128>}, {transform_indices = @transform_3, window_bounds = array<i64: 1, 128, 128>}]} {
    %c0 = arith.constant 0 : index
    %c0_0 = arith.constant 0 : index
    %c0_1 = arith.constant 0 : index
    %c0_2 = arith.constant 0 : index
    %c0_3 = arith.constant 0 : index
    %0 = vector.load %arg2[%c0, %c0_0, %c0_1, %c0_2, %c0_3] : memref<1x1x10x18x4xf32, #tpu.memory_space<vmem>>, vector<1x1x10x18x4xf32>
    %1 = vector.shape_cast %0 : vector<1x1x10x18x4xf32> to vector<10x18x4xf32>
    %c0_4 = arith.constant 0 : index
    %c0_5 = arith.constant 0 : index
    %c0_6 = arith.constant 0 : index
    %c0_7 = arith.constant 0 : index
    %2 = vector.load %arg3[%c0_4, %c0_5, %c0_6, %c0_7] : memref<9x1x1x4xf32, #tpu.memory_space<vmem>>, vector<9x1x1x4xf32>
    %3 = vector.extract_strided_slice %1 {offsets = [0, 0, 0], sizes = [8, 16, 4], strides = [1, 1, 1]} : vector<10x18x4xf32> to vector<8x16x4xf32>
    %4 = vector.extract_strided_slice %2 {offsets = [0, 0, 0, 0], sizes = [1, 1, 1, 4], strides = [1, 1, 1, 1]} : vector<9x1x1x4xf32> to vector<1x1x1x4xf32>
    %5 = vector.shape_cast %4 : vector<1x1x1x4xf32> to vector<1x1x4xf32>
    %6 = vector.broadcast %5 : vector<1x1x4xf32> to vector<8x16x4xf32>
    %7 = arith.mulf %3, %6 : vector<8x16x4xf32>
    %8 = vector.extract_strided_slice %1 {offsets = [0, 1, 0], sizes = [8, 16, 4], strides = [1, 1, 1]} : vector<10x18x4xf32> to vector<8x16x4xf32>
    %9 = vector.extract_strided_slice %2 {offsets = [1, 0, 0, 0], sizes = [1, 1, 1, 4], strides = [1, 1, 1, 1]} : vector<9x1x1x4xf32> to vector<1x1x1x4xf32>
    %10 = vector.shape_cast %9 : vector<1x1x1x4xf32> to vector<1x1x4xf32>
    %11 = vector.broadcast %10 : vector<1x1x4xf32> to vector<8x16x4xf32>
    %12 = arith.mulf %8, %11 : vector<8x16x4xf32>
    %13 = arith.addf %7, %12 : vector<8x16x4xf32>
    %14 = vector.extract_strided_slice %1 {offsets = [0, 2, 0], sizes = [8, 16, 4], strides = [1, 1, 1]} : vector<10x18x4xf32> to vector<8x16x4xf32>
    %15 = vector.extract_strided_slice %2 {offsets = [2, 0, 0, 0], sizes = [1, 1, 1, 4], strides = [1, 1, 1, 1]} : vector<9x1x1x4xf32> to vector<1x1x1x4xf32>
    %16 = vector.shape_cast %15 : vector<1x1x1x4xf32> to vector<1x1x4xf32>
    %17 = vector.broadcast %16 : vector<1x1x4xf32> to vector<8x16x4xf32>
    %18 = arith.mulf %14, %17 : vector<8x16x4xf32>
    %19 = arith.addf %13, %18 : vector<8x16x4xf32>
    %20 = vector.extract_strided_slice %1 {offsets = [1, 0, 0], sizes = [8, 16, 4], strides = [1, 1, 1]} : vector<10x18x4xf32> to vector<8x16x4xf32>
    %21 = vector.extract_strided_slice %2 {offsets = [3, 0, 0, 0], sizes = [1, 1, 1, 4], strides = [1, 1, 1, 1]} : vector<9x1x1x4xf32> to vector<1x1x1x4xf32>
    %22 = vector.shape_cast %21 : vector<1x1x1x4xf32> to vector<1x1x4xf32>
    %23 = vector.broadcast %22 : vector<1x1x4xf32> to vector<8x16x4xf32>
    %24 = arith.mulf %20, %23 : vector<8x16x4xf32>
    %25 = arith.addf %19, %24 : vector<8x16x4xf32>
    %26 = vector.extract_strided_slice %1 {offsets = [1, 1, 0], sizes = [8, 16, 4], strides = [1, 1, 1]} : vector<10x18x4xf32> to vector<8x16x4xf32>
    %27 = vector.extract_strided_slice %2 {offsets = [4, 0, 0, 0], sizes = [1, 1, 1, 4], strides = [1, 1, 1, 1]} : vector<9x1x1x4xf32> to vector<1x1x1x4xf32>
    %28 = vector.shape_cast %27 : vector<1x1x1x4xf32> to vector<1x1x4xf32>
    %29 = vector.broadcast %28 : vector<1x1x4xf32> to vector<8x16x4xf32>
    %30 = arith.mulf %26, %29 : vector<8x16x4xf32>
    %31 = arith.addf %25, %30 : vector<8x16x4xf32>
    %32 = vector.extract_strided_slice %1 {offsets = [1, 2, 0], sizes = [8, 16, 4], strides = [1, 1, 1]} : vector<10x18x4xf32> to vector<8x16x4xf32>
    %33 = vector.extract_strided_slice %2 {offsets = [5, 0, 0, 0], sizes = [1, 1, 1, 4], strides = [1, 1, 1, 1]} : vector<9x1x1x4xf32> to vector<1x1x1x4xf32>
    %34 = vector.shape_cast %33 : vector<1x1x1x4xf32> to vector<1x1x4xf32>
    %35 = vector.broadcast %34 : vector<1x1x4xf32> to vector<8x16x4xf32>
    %36 = arith.mulf %32, %35 : vector<8x16x4xf32>
    %37 = arith.addf %31, %36 : vector<8x16x4xf32>
    %38 = vector.extract_strided_slice %1 {offsets = [2, 0, 0], sizes = [8, 16, 4], strides = [1, 1, 1]} : vector<10x18x4xf32> to vector<8x16x4xf32>
    %39 = vector.extract_strided_slice %2 {offsets = [6, 0, 0, 0], sizes = [1, 1, 1, 4], strides = [1, 1, 1, 1]} : vector<9x1x1x4xf32> to vector<1x1x1x4xf32>
    %40 = vector.shape_cast %39 : vector<1x1x1x4xf32> to vector<1x1x4xf32>
    %41 = vector.broadcast %40 : vector<1x1x4xf32> to vector<8x16x4xf32>
    %42 = arith.mulf %38, %41 : vector<8x16x4xf32>
    %43 = arith.addf %37, %42 : vector<8x16x4xf32>
    %44 = vector.extract_strided_slice %1 {offsets = [2, 1, 0], sizes = [8, 16, 4], strides = [1, 1, 1]} : vector<10x18x4xf32> to vector<8x16x4xf32>
    %45 = vector.extract_strided_slice %2 {offsets = [7, 0, 0, 0], sizes = [1, 1, 1, 4], strides = [1, 1, 1, 1]} : vector<9x1x1x4xf32> to vector<1x1x1x4xf32>
    %46 = vector.shape_cast %45 : vector<1x1x1x4xf32> to vector<1x1x4xf32>
    %47 = vector.broadcast %46 : vector<1x1x4xf32> to vector<8x16x4xf32>
    %48 = arith.mulf %44, %47 : vector<8x16x4xf32>
    %49 = arith.addf %43, %48 : vector<8x16x4xf32>
    %50 = vector.extract_strided_slice %1 {offsets = [2, 2, 0], sizes = [8, 16, 4], strides = [1, 1, 1]} : vector<10x18x4xf32> to vector<8x16x4xf32>
    %51 = vector.extract_strided_slice %2 {offsets = [8, 0, 0, 0], sizes = [1, 1, 1, 4], strides = [1, 1, 1, 1]} : vector<9x1x1x4xf32> to vector<1x1x1x4xf32>
    %52 = vector.shape_cast %51 : vector<1x1x1x4xf32> to vector<1x1x4xf32>
    %53 = vector.broadcast %52 : vector<1x1x4xf32> to vector<8x16x4xf32>
    %54 = arith.mulf %50, %53 : vector<8x16x4xf32>
    %55 = arith.addf %49, %54 : vector<8x16x4xf32>
    %56 = vector.shape_cast %55 : vector<8x16x4xf32> to vector<128x4xf32>
    %c0_8 = arith.constant 0 : index
    %c0_9 = arith.constant 0 : index
    %57 = vector.load %arg4[%c0_8, %c0_9] : memref<4x128xf32, #tpu.memory_space<vmem>>, vector<4x128xf32>
    %cst = arith.constant dense<0.000000e+00> : vector<128x128xf32>
    %58 = tpu.matmul %56, %57, %cst {dimension_numbers = #tpu.dot_dimension_numbers<[1], [0], [0], [1], [0, 0, 1, 1], [], []>} : vector<128x4xf32>, vector<4x128xf32>, vector<128x128xf32> -> vector<128x128xf32>
    %c0_10 = arith.constant 0 : index
    %c0_11 = arith.constant 0 : index
    %c0_12 = arith.constant 0 : index
    %59 = vector.load %arg5[%c0_10, %c0_11, %c0_12] : memref<1x128x128xf32, #tpu.memory_space<vmem>>, vector<1x128x128xf32>
    %60 = vector.shape_cast %59 : vector<1x128x128xf32> to vector<128x128xf32>
    %61 = vector.shape_cast %58 : vector<128x128xf32> to vector<1x128x128xf32>
    tpu.vector_store %arg5[%c0_10, %c0_11, %c0_12], %61 {strides = array<i32>} : memref<1x128x128xf32, #tpu.memory_space<vmem>>, vector<1x128x128xf32>,
    return
  }
  func.func @transform_0(%arg0: i32, %arg1: i32) -> (i32, i32, i32, i32, i32) {
    %c0_i32 = arith.constant 0 : i32
    %c0_i32_0 = arith.constant 0 : i32
    %c0_i32_1 = arith.constant 0 : i32
    %c0_i32_2 = arith.constant 0 : i32
    return %arg0, %arg1, %c0_i32, %c0_i32_0, %c0_i32_1 : i32, i32, i32, i32, i32
  }
  func.func @transform_1(%arg0: i32, %arg1: i32) -> (i32, i32, i32, i32) {
    %c0_i32 = arith.constant 0 : i32
    %c0_i32_0 = arith.constant 0 : i32
    %c0_i32_1 = arith.constant 0 : i32
    %c0_i32_2 = arith.constant 0 : i32
    %c0_i32_3 = arith.constant 0 : i32
    return %c0_i32, %c0_i32_0, %c0_i32_1, %c0_i32_2 : i32, i32, i32, i32
  }
  func.func @transform_2(%arg0: i32, %arg1: i32) -> (i32, i32) {
    %c0_i32 = arith.constant 0 : i32
    %c0_i32_0 = arith.constant 0 : i32
    %c0_i32_1 = arith.constant 0 : i32
    return %c0_i32, %c0_i32_0 : i32, i32
  }
  func.func @transform_3(%arg0: i32, %arg1: i32) -> (i32, i32, i32) {
    %c0_i32 = arith.constant 0 : i32
    %c0_i32_0 = arith.constant 0 : i32
    return %arg0, %arg1, %c0_i32 : i32, i32, i32
  }
}

</mosaic_0001>

<bundles_post_ra>
// kernel: tpu_custom_call.1
= control target key start
LH: loop header
LB: loop body
LE: loop exit
PB: predicated region body
PF: predicated region fallthrough
CT: control target
= control target key end

     0   :  { %8 = vsyncpa [#allocation3], 0  ;;  %s2686_s0 = inlined_call_operand.vmem [shape: f32[2,2,10,18,4], index: 0, kind: input, shape index: {}]   ;;  %s2687_s1 = inlined_call_operand.vmem [shape: f32[9,1,1,4], index: 1, kind: input, shape index: {}]   ;;  %s2688_s2 = inlined_call_operand.vmem [shape: f32[4,128], index: 2, kind: input, shape index: {}]   ;;  %s2689_s3 = inlined_call_operand.hbm [shape: f32[2,256,128], index: 3, kind: output, shape index: {}]  }
   0x1   :  { %10 = vsyncpa [#allocation3 + $0x1], 0  ;;  %s1550_s12 = smov 0   ;;  %s1552_s13 = smov 0  }
   0x2   :  { %s1554_s14 = smov 0   ;;  %s1556_s15 = smov 0  }
   0x3   :  { %s1558_s16 = smov 0   ;;  %s1560_s17 = smov 0  }
   0x4   :  { %s1562_s18 = smov 0   ;;  %s1564_s19 = smov 0  }
   0x5 LB: > { %s1304_s20 = sadd.s32 4294967295, %s1526_s19   ;;  %s1305_s21 = sadd.s32 4294967294, %s1526_s19   ;;  %s1526_s19 = sphi %s1564_s19, %s16_s19   ;;  %s1522_s18 = sphi %s1562_s18, %s2843_s18   ;;  %s1518_s17 = sphi %s1560_s17, %s2842_s17   ;;  %s1514_s16 = sphi %s1558_s16, %s2841_s16   ;;  %s1510_s15 = sphi %s1556_s15, %s2840_s15   ;;  %s1506_s14 = sphi %s1554_s14, %s2839_s14   ;;  %s1502_s13 = sphi %s1552_s13, %s2838_s13   ;;  %s1498_s12 = sphi %s1550_s12, %s2837_s12  }
   0x6   : > { %s25_s22 = sadd.s32 1, %s1518_s17  ;;  %s28_s23 = sadd.s32 1, %s1522_s18 }
   0x7   : > { %p26_p0 = scmp.ge.s32.totalorder %s25_s22, 2  ;;  %p117_p1 = scmp.ne.s32.totalorder %s1506_s14, %s1502_s13 }
   0x8   : > { %p118_p2 = scmp.eq.s32.totalorder %s1304_s20, 3  ;;  %p123_p5 = scmp.ne.s32.totalorder %s1502_s13, %s1498_s12 }
   0x9   : > { %s2845_s22 = smov (%p26_p0, %s25_s22), 0  ;;  %s2847_s23 = smov (!%p26_p0, %s28_s23), %s1522_s18 }
   0xa   : > { %s103_s24 = ssub.s32 %s1518_s17, %s2845_s22  ;;  %p1601_p3 = por %p118_p2, %p117_p1 }
   0xb   : > { %p30_p4 = scmp.ge.s32.totalorder %s2847_s23, 2  ;;  %p124_p6 = scmp.eq.s32.totalorder %s1305_s21, 3 }
   0xc   : > { %p1308_p7 = scmp.ge.s32.totalorder %s1526_s19, 1  ;;  %p160_p9 = scmp.lt.s32.totalorder %s1526_s19, 5 }
   0xd   : > { %s2849_s23 = smov (%p30_p4, %s2847_s23), 0  ;;  %p1610_p8 = por %p124_p6, %p123_p5 }
   0xe   : > { %s102_s27 = ssub.s32 %s1522_s18, %s2849_s23  ;;  %s107_s28 = sadd.s32 1, %s1506_s14 }
   0xf   : > { %s104_s29 = sor.u32 %s103_s24, %s102_s27  ;;  %p161_p10 = pnand %p1308_p7, %p160_p9 }
  0x10   : > { %p105_p11 = scmp.eq.s32.totalorder %s104_s29, 0 }
  0x11   : > { %164 = sbr.rel (%p161_p10) target bundleno = 325 (0x145), region = 32 }
  0x12   : > { %s1619_s30 = scalar_select %p105_p11, %s1506_s14, %s107_s28  }
  0x16   : > { %v1066_v0 = vld [vmem:[%s2688_s2] sm:$0xf]  ;;  %vm1116_vm0 = vcmask 1043456   ;;  %p188_p12 = scmp.lt.s32.totalorder %s1514_s16, 1  ;;  %p190_p13 = scmp.lt.s32.totalorder %s1510_s15, 1  ;;  %vm307_vm1 = vcmask 1046528  }
  0x17   : > { %1335 = vmatpush.msk.msra.mxu2 %vm1116_vm0, %v1066_v0  ;;  %1336 = vmatpush.msk.msra.mxu3 %vm1116_vm0, %v1066_v0  ;;  %v1631_v1 = vld [vmem:[%s2687_s1] ss:$0 sm:$0xff]  ;;  %v1636_v2 = vld [vmem:[%s2687_s1 + $0x1] ss:$0 sm:$0xff]  ;;  %v1641_v3 = vld [vmem:[%s2687_s1 + $0x2] ss:$0 sm:$0xff] }
  0x18   : > { %s189_s6 = scalar_select %p188_p12, %s1514_s16, 1  ;;  %1311 = vmatpush.msk.msra.mxu0 %vm1116_vm0, %v1066_v0  ;;  %1334 = vmatpush.msk.msra.mxu1 %vm1116_vm0, %v1066_v0  ;;  %v1646_v4 = vld [vmem:[%s2687_s1 + $0x3] ss:$0 sm:$0xff]  ;;  %v1651_v5 = vld [vmem:[%s2687_s1 + $0x4] ss:$0 sm:$0xff]  ;;  %vm431_vm2 = vcmask 1045504  }
  0x19   : > { %s191_s7 = scalar_select %p190_p13, %s1510_s15, 1  ;;  %v1661_v6 = vld [vmem:[%s2687_s1 + $0x5] ss:$0 sm:$0xff]  ;;  %v1688_v15 = vld [vmem:[%s2687_s1 + $0x6] ss:$0 sm:$0xff]  ;;  %vm1067_vm3 = vcmask 31744  }
  0x1a   : > { %s1338_s8 = smul.u32 60, %s189_s6  ;;  %v1693_v16 = vld [vmem:[%s2687_s1 + $0x7] ss:$0 sm:$0xff]  ;;  %v1713_v25 = vld [vmem:[%s2687_s1 + $0x8] ss:$0 sm:$0xff]  ;;  %s185_s20 = sand.u32 1, %s1502_s13  }
  0x1b   : > { %s1337_s9 = smul.u32 30, %s191_s7  ;;  %s1309_s21 = sshll.u32 %s185_s20, 7 }
  0x1c   : > { %s1330_s24 = sshll.u32 %s1514_s16, 5 }
  0x1d   : > { %s194_s10 = sadd.s32 %s1338_s8, %s1337_s9 }
  0x1e   : > { %s1310_s29 = sshll.u32 %s194_s10, 3  ;;  %s1329_s10 = sshll.u32 %s1510_s15, 4 }
  0x1f   : > { %s1656_s11 = scalar_lea.vmem %s2686_s0, %s1310_s29  ;;  %s1213_s27 = sadd.s32 %s1330_s24, %s1329_s10 }
  0x20   : > { %v1664_v7 = vld [vmem:[%s1656_s11 + $0x60] sm:$0xff]  ;;  %v1667_v8 = vld [vmem:[%s1656_s11 + $0x68] sm:$0xff]  ;;  %v1670_v9 = vld [vmem:[%s1656_s11 + $0x78] sm:$0xff]  ;;  %s1331_s28 = sshll.u32 %s1213_s27, 3  ;;  %s1202_s15 = scalar_lea.sflag [#allocation3], %s185_s20 }
  0x21   : > { %2760 = vst [vmem:[#allocation5_spill] sm:$0xff] %v1664_v7  ;;  %v1673_v10 = vld [vmem:[%s1656_s11 + $0x80] sm:$0xff]  ;;  %v248_v11 = vmul.f32 %v1631_v1, %v1664_v7  ;;  %v271_v12 = vmul.f32 %v1636_v2, %v1664_v7  ;;  %v1681_v13 = vmul.f32 %v1636_v2, %v1667_v8  ;;  %v395_v14 = vmul.f32 %v1641_v3, %v1664_v7  ;;  %v1716_v26 = vld [vmem:[%s1656_s11 + $0x90] sm:$0xff]  ;;  %v1732_v35 = vld [vmem:[%s1656_s11 + $0x98] sm:$0xff]  ;;  %s1215_s5 = scalar_lea.hbm %s2689_s3, %s1331_s28  ;;  %s1452_s10 = scalar_lea.hbm %s2689_s3, 512 }
  0x22   : > { %2761 = vst [vmem:[#allocation6_spill] sm:$0xff] %v1673_v10  ;;  %v1697_v17 = vmul.f32 %v1641_v3, %v1667_v8  ;;  %v515_v18 = vmul.f32 %v1646_v4, %v1670_v9  ;;  %v554_v19 = vmul.f32 %v1651_v5, %v1670_v9  ;;  %v1705_v20 = vmul.f32 %v1651_v5, %v1673_v10  ;;  %v1755_v46 = vld [vmem:[%s1656_s11 + $0xa8] sm:$0xff]  ;;  %v1768_v54 = vld [vmem:[%s1656_s11 + $0xb0] sm:$0xff]  ;;  %v1786_v63 = vld [vmem:[%s1656_s11 + $0xc0] sm:$0xff]  ;;  %s1218_s7 = sshll.u32 %s1215_s5, 4  ;;  %s1219_s7 = int_to_ptr.hbm [resolvable:$true] %s1218_s7 }
  0x23   : > { %v328_v21 = vrot.slane %v271_v12, 1  ;;  %v2705_v22 = vrot.slane %v1681_v13, 1  ;;  %v452_v23 = vrot.slane %v395_v14, 2  ;;  %v677_v24 = vmul.f32 %v1661_v6, %v1670_v9  ;;  %2762 = vst [vmem:[#allocation7_spill] sm:$0xff] %v1716_v26  ;;  %v1792_v14 = vld [vmem:[%s1656_s11 + $0xc8] sm:$0xff]  ;;  %s1446_s16 = sshra.s32 %s1219_s7, 4  ;;  %s1447_s16 = int_to_ptr.hbm [resolvable:$true] %s1446_s16 }
  0x24   : > { %v2704_v27 = vrot.slane %v1697_v17, 2  ;;  %v610_v28 = vrot.slane %v554_v19, 1  ;;  %v2703_v29 = vrot.slane %v1705_v20, 1  ;;  %v1722_v30 = vmul.f32 %v1661_v6, %v1673_v10  ;;  %2763 = vst [vmem:[#allocation8_spill] sm:$0xff] %v1755_v46  ;;  %s1448_s8 = scalar_lea.hbm %s1447_s16, 128  ;;  %p1453_p4 = scmp.lt.s32.totalorder %s1447_s16, %s2689_s3 }
  0x25   : > { %v330_v31 = vsel %vm307_vm1, %v328_v21, %v2705_v22  ;;  %v733_v32 = vrot.slane %v677_v24, 2  ;;  %v796_v33 = vmul.f32 %v1688_v15, %v1716_v26  ;;  %v835_v34 = vmul.f32 %v1693_v16, %v1716_v26  ;;  %2764 = vst [vmem:[#allocation9_spill] sm:$0xff] %v1786_v63  ;;  %p1449_p0 = scmp.ne.s32.totalorder %s1447_s16, %s1448_s8  ;;  %p1454_p5 = scmp.lt.s32.totalorder %s1452_s10, %s1448_s8 }
  0x26   : > { %v372_v36 = vadd.f32 %v330_v31, %v248_v11  ;;  %v454_v37 = vsel %vm431_vm2, %v452_v23, %v2704_v27  ;;  %v612_v38 = vsel %vm307_vm1, %v610_v28, %v2703_v29  ;;  %v2700_v39 = vrot.slane %v1722_v30, 2 }
  0x27   : > { %v1743_v40 = vmul.f32 %v1693_v16, %v1732_v35  ;;  %v891_v41 = vrot.slane %v835_v34, 1  ;;  %v958_v42 = vmul.f32 %v1713_v25, %v1716_v26  ;;  %v1749_v43 = vmul.f32 %v1713_v25, %v1732_v35  ;;  %p1450_p1 = pnand %p1449_p0, %p1601_p3  ;;  %p1455_p6 = por %p1454_p5, %p1453_p4 }
  0x28   : > { %v496_v44 = vadd.f32 %v454_v37, %v372_v36  ;;  %v735_v45 = vsel %vm431_vm2, %v733_v32, %v2700_v39  ;;  %v252_v47 = vmul.f32 %v1631_v1, %v1716_v26  ;;  %v277_v48 = vmul.f32 %v1636_v2, %v1716_v26  ;;  %v1914_v39 = vld [vmem:[%s1656_s11 + $0x48] sm:$0xff] }
  0x29   : > { %v2699_v49 = vrot.slane %v1743_v40, 1  ;;  %v1014_v50 = vrot.slane %v958_v42, 2  ;;  %v2698_v51 = vrot.slane %v1749_v43, 2  ;;  %v1765_v52 = vmul.f32 %v1636_v2, %v1732_v35  ;;  %2767 = vst [vmem:[#allocation12_spill] sm:$0xff] %v1914_v39  ;;  %p1451_p2 = pneg %p1450_p1 }
  0x2a   : > { %v531_v53 = vadd.f32 %v515_v18, %v496_v44  ;;  %v338_v55 = vrot.slane %v277_v48, 1  ;;  %v401_v56 = vmul.f32 %v1641_v3, %v1716_v26  ;;  %v1774_v57 = vmul.f32 %v1641_v3, %v1732_v35 }
  0x2b   : > { %v893_v58 = vsel %vm307_vm1, %v891_v41, %v2699_v49  ;;  %v1016_v59 = vsel %vm431_vm2, %v1014_v50, %v2698_v51  ;;  %v2695_v60 = vrot.slane %v1765_v52, 1  ;;  %v519_v61 = vmul.f32 %v1646_v4, %v1755_v46  ;;  %p1456_p7 = pnand %p1455_p6, %p1451_p2 }
  0x2c   : > { %v654_v62 = vadd.f32 %v612_v38, %v531_v53  ;;  %v462_v0 = vrot.slane %v401_v56, 2  ;;  %v2694_v11 = vrot.slane %v1774_v57, 2  ;;  %v560_v12 = vmul.f32 %v1651_v5, %v1755_v46 }
  0x2d   : > { %v340_v18 = vsel %vm307_vm1, %v338_v55, %v2695_v60  ;;  %v1799_v19 = vmul.f32 %v1651_v5, %v1768_v54  ;;  %v683_v21 = vmul.f32 %v1661_v6, %v1755_v46  ;;  %v1805_v23 = vmul.f32 %v1661_v6, %v1768_v54  ;;  %v1834_v55 = vld [vmem:[%s1656_s11 + $0x8] sm:$0xff] }
  0x2e   : > { %v777_v24 = vadd.f32 %v735_v45, %v654_v62  ;;  %v376_v28 = vadd.f32 %v340_v18, %v252_v47  ;;  %v464_v31 = vsel %vm431_vm2, %v462_v0, %v2694_v11  ;;  %v620_v32 = vrot.slane %v560_v12, 1  ;;  %v198_v47 = vld [vmem:[%s1656_s11] sm:$0xff] }
  0x2f   : > { %v2693_v34 = vrot.slane %v1799_v19, 1  ;;  %v743_v36 = vrot.slane %v683_v21, 2  ;;  %v2690_v37 = vrot.slane %v1805_v23, 2  ;;  %v800_v38 = vmul.f32 %v1688_v15, %v1786_v63 }
  0x30   : > { %v812_v41 = vadd.f32 %v796_v33, %v777_v24  ;;  %v500_v42 = vadd.f32 %v464_v31, %v376_v28  ;;  %v841_v44 = vmul.f32 %v1693_v16, %v1786_v63  ;;  %v1818_v45 = vmul.f32 %v1693_v16, %v1792_v14  ;;  %v1839_v24 = vld [vmem:[%s1656_s11 + $0x18] sm:$0xff] }
  0x31   : > { %v622_v48 = vsel %vm307_vm1, %v620_v32, %v2693_v34  ;;  %v745_v50 = vsel %vm431_vm2, %v743_v36, %v2690_v37  ;;  %v964_v33 = vmul.f32 %v1713_v25, %v1786_v63  ;;  %v1831_v53 = vmul.f32 %v1713_v25, %v1792_v14  ;;  %2765 = vst [vmem:[#allocation10_spill] sm:$0xff] %v1839_v24 }
  0x32   : > { %v935_v56 = vadd.f32 %v893_v58, %v812_v41  ;;  %v535_v62 = vadd.f32 %v519_v61, %v500_v42  ;;  %v901_v0 = vrot.slane %v841_v44, 1  ;;  %v2692_v12 = vrot.slane %v1818_v45, 1  ;;  %v1847_v58 = vld [vmem:[%s1656_s11 + $0x20] sm:$0xff] }
  0x33   : > { %v1024_v18 = vrot.slane %v964_v33, 2  ;;  %v2691_v21 = vrot.slane %v1831_v53, 2  ;;  %v240_v28 = vmul.f32 %v1631_v1, %v198_v47  ;;  %v259_v31 = vmul.f32 %v1636_v2, %v198_v47 }
  0x34   : > { %v1058_v32 = vadd.f32 %v1016_v59, %v935_v56  ;;  %v658_v36 = vadd.f32 %v622_v48, %v535_v62  ;;  %v903_v37 = vsel %vm307_vm1, %v901_v0, %v2692_v12  ;;  %v1851_v61 = vmul.f32 %v1636_v2, %v1834_v55 }
  0x35   : > { %v1026_v41 = vsel %vm431_vm2, %v1024_v18, %v2691_v21  ;;  %v308_v42 = vrot.slane %v259_v31, 1  ;;  %v383_v44 = vmul.f32 %v1641_v3, %v198_v47  ;;  %v1859_v59 = vmul.f32 %v1641_v3, %v1834_v55 }
  0x36   : > { %1320 = vmatmul.msk.f32.vlgmr.msra.gmra.mxu2 %vm1067_vm3, %v1058_v32  ;;  %v781_v48 = vadd.f32 %v745_v50, %v658_v36  ;;  %v2696_v33 = vrot.slane %v1851_v61, 1  ;;  %v507_v56 = vmul.f32 %v1646_v4, %v1839_v24  ;;  %v542_v62 = vmul.f32 %v1651_v5, %v1839_v24 }
  0x37   : > { %v432_v0 = vrot.slane %v383_v44, 2  ;;  %v2697_v18 = vrot.slane %v1859_v59, 2  ;;  %v1870_v47 = vmul.f32 %v1651_v5, %v1847_v58  ;;  %v665_v31 = vmul.f32 %v1661_v6, %v1839_v24  ;;  %v1882_v44 = vld [vmem:[%s1656_s11 + $0x30] sm:$0xff] }
  0x38   : > { %v816_v50 = vadd.f32 %v800_v38, %v781_v48  ;;  %v310_v32 = vsel %vm307_vm1, %v308_v42, %v2696_v33  ;;  %v590_v36 = vrot.slane %v542_v62, 1  ;;  %v1879_v21 = vmul.f32 %v1661_v6, %v1847_v58  ;;  %2766 = vst [vmem:[#allocation11_spill] sm:$0xff] %v1882_v44  ;;  %v1889_v48 = vld [vmem:[%s1656_s11 + $0x38] sm:$0xff] }
  0x39   : > { %v364_v12 = vadd.f32 %v310_v32, %v240_v28  ;;  %v434_v34 = vsel %vm431_vm2, %v432_v0, %v2697_v18  ;;  %v2702_v11 = vrot.slane %v1870_v47, 1  ;;  %v713_v60 = vrot.slane %v665_v31, 2 }
  0x3a   : > { %v939_v38 = vadd.f32 %v903_v37, %v816_v50  ;;  %v2701_v42 = vrot.slane %v1879_v21, 2  ;;  %v823_v62 = vmul.f32 %v1693_v16, %v1882_v44  ;;  %v788_v28 = vmul.f32 %v1688_v15, %v1882_v44 }
  0x3b   : > { %v488_v33 = vadd.f32 %v434_v34, %v364_v12  ;;  %v1898_v0 = vmul.f32 %v1693_v16, %v1889_v48  ;;  %v946_v37 = vmul.f32 %v1713_v25, %v1882_v44  ;;  %v592_v50 = vsel %vm307_vm1, %v590_v36, %v2702_v11  ;;  %v1919_v36 = vld [vmem:[%s1656_s11 + $0x50] sm:$0xff] }
  0x3c   : > { %v1062_v31 = vadd.f32 %v1026_v41, %v939_v38  ;;  %v871_v32 = vrot.slane %v823_v62, 1  ;;  %v1907_v18 = vmul.f32 %v1713_v25, %v1889_v48  ;;  %v715_v12 = vsel %vm431_vm2, %v713_v60, %v2701_v42  ;;  %2768 = vst [vmem:[#allocation13_spill] sm:$0xff] %v1919_v36 }
  0x3d   : > { %v523_v34 = vadd.f32 %v507_v56, %v488_v33  ;;  %v2706_v51 = vrot.slane %v1898_v0, 1  ;;  %v994_v49 = vrot.slane %v946_v37, 2  ;;  %v265_v38 = vmul.f32 %v1636_v2, %v1882_v44 }
  0x3e   : > { %1324 = vmatmul.msk.f32.vlgmr.msra.gmra.mxu3 %vm1067_vm3, %v1062_v31  ;;  %v2711_v41 = vrot.slane %v1907_v18, 2  ;;  %v1925_v33 = vmul.f32 %v1636_v2, %v1889_v48  ;;  %v389_v60 = vmul.f32 %v1641_v3, %v1882_v44  ;;  %v244_v37 = vmul.f32 %v1631_v1, %v1882_v44 }
  0x3f   : > { %v646_v56 = vadd.f32 %v592_v50, %v523_v34  ;;  %v873_v62 = vsel %vm307_vm1, %v871_v32, %v2706_v51  ;;  %v1936_v31 = vmul.f32 %v1641_v3, %v1889_v48  ;;  %v318_v42 = vrot.slane %v265_v38, 1 }
  0x40   : > { %v2714_v11 = vrot.slane %v1925_v33, 1  ;;  %v442_v29 = vrot.slane %v389_v60, 2  ;;  %v511_v27 = vmul.f32 %v1646_v4, %v1914_v39  ;;  %v548_v32 = vmul.f32 %v1651_v5, %v1914_v39 }
  0x41   : > { %v769_v22 = vadd.f32 %v715_v12, %v646_v56  ;;  %v1946_v34 = vmul.f32 %v1651_v5, %v1919_v36  ;;  %v996_v38 = vsel %vm431_vm2, %v994_v49, %v2711_v41  ;;  %v671_v12 = vmul.f32 %v1661_v6, %v1914_v39 }
  0x42   : > { %v320_v60 = vsel %vm307_vm1, %v318_v42, %v2714_v11  ;;  %v1958_v56 = vmul.f32 %v1661_v6, %v1919_v36  ;;  %v2770_v44 = vrot.slane %v1936_v31, 2  ;;  %v600_v49 = vrot.slane %v548_v32, 1 }
  0x43   : > { %v804_v51 = vadd.f32 %v788_v28, %v769_v22  ;;  %v368_v50 = vadd.f32 %v320_v60, %v244_v37  ;;  %v2719_v41 = vrot.slane %v1946_v34, 1  ;;  %v723_v63 = vrot.slane %v671_v12, 2  ;;  %v1974_v37 = vld [vmem:[%s1656_s11 + $0x70] sm:$0x3] }
  0x44   : > { %2769 = vst [vmem:[#allocation14_spill] sm:$0xff] %v1958_v56  ;;  %v444_v24 = vsel %vm431_vm2, %v442_v29, %v2770_v44  ;;  %v2724_v42 = vrot.slane %v1958_v56, 2  ;;  %v829_v11 = vmul.f32 %v1693_v16, %v1664_v7  ;;  %v1969_v22 = vmul.f32 %v1693_v16, %v1667_v8 }
  0x45   : > { %v927_v39 = vadd.f32 %v873_v62, %v804_v51  ;;  %v492_v46 = vadd.f32 %v444_v24, %v368_v50  ;;  %v952_v28 = vmul.f32 %v1713_v25, %v1664_v7  ;;  %2772 = vst [vmem:[#allocation16_spill] sm:$0xff] %v1974_v37  ;;  %v602_v29 = vsel %vm307_vm1, %v600_v49, %v2719_v41  ;;  %v1986_v24 = vld [vmem:[%s1656_s11 + $0x88] sm:$0x3] }
  0x46   : > { %2771 = vst [vmem:[#allocation15_spill] sm:$0xff] %v1969_v22  ;;  %v792_v44 = vmul.f32 %v1688_v15, %v1664_v7  ;;  %v881_v32 = vrot.slane %v829_v11, 1  ;;  %v1983_v51 = vmul.f32 %v1713_v25, %v1667_v8  ;;  %v2725_v60 = vrot.slane %v1969_v22, 1 }
  0x47   : > { %2773 = vst [vmem:[#allocation17_spill] sm:$0xff] %v1986_v24  ;;  %v1050_v62 = vadd.f32 %v996_v38, %v927_v39  ;;  %v527_v50 = vadd.f32 %v511_v27, %v492_v46  ;;  %v1004_v12 = vrot.slane %v952_v28, 2  ;;  %v725_v49 = vsel %vm431_vm2, %v723_v63, %v2724_v42  ;;  %v2006_v63 = vld [vmem:[%s1656_s11 + $0xa0] sm:$0x3] }
  0x48   : > { %v2732_v41 = vrot.slane %v1983_v51, 2  ;;  %v273_v11 = vmul.f32 %v1636_v2, %v1974_v37  ;;  %v397_v7 = vmul.f32 %v1641_v3, %v1974_v37  ;;  %v883_v27 = vsel %vm307_vm1, %v881_v32, %v2725_v60 }
  0x49   : > { %1312 = vmatmul.msk.f32.vlgmr.msra.gmra.mxu0 %vm1067_vm3, %v1050_v62  ;;  %v650_v26 = vadd.f32 %v602_v29, %v527_v50  ;;  %v249_v39 = vmul.f32 %v1631_v1, %v1667_v8  ;;  %v556_v46 = vmul.f32 %v1651_v5, %v1986_v24  ;;  %v516_v42 = vmul.f32 %v1646_v4, %v1673_v10 }
  0x4a   : > { %v331_v38 = vrot.slane %v273_v11, 1  ;;  %v455_v28 = vrot.slane %v397_v7, 2  ;;  %v679_v29 = vmul.f32 %v1661_v6, %v1986_v24  ;;  %v1006_v32 = vsel %vm431_vm2, %v1004_v12, %v2732_v41  ;;  %v2028_v41 = vld [vmem:[%s1656_s11 + $0xb8] sm:$0x3] }
  0x4b   : > { %v773_v62 = vadd.f32 %v725_v49, %v650_v26  ;;  %v613_v50 = vrot.slane %v556_v46, 1  ;;  %v837_v60 = vmul.f32 %v1693_v16, %v2006_v63  ;;  %v2774_v22 = vrot.slane %v1681_v13, 1 }
  0x4c   : > { %v2775_v11 = vrot.slane %v1697_v17, 2  ;;  %v736_v10 = vrot.slane %v679_v29, 2  ;;  %v960_v26 = vmul.f32 %v1713_v25, %v2006_v63  ;;  %v797_v12 = vmul.f32 %v1688_v15, %v1732_v35 }
  0x4d   : > { %v332_v7 = vsel %vm307_vm1, %v2774_v22, %v331_v38  ;;  %v808_v49 = vadd.f32 %v792_v44, %v773_v62  ;;  %v894_v46 = vrot.slane %v837_v60, 1  ;;  %v2776_v13 = vrot.slane %v1705_v20, 1  ;;  %v2039_v62 = vld [vmem:[%s1656_s11 + $0xd0] sm:$0x3] }
  0x4e   : > { %v456_v56 = vsel %vm431_vm2, %v2775_v11, %v455_v28  ;;  %v373_v24 = vadd.f32 %v332_v7, %v249_v39  ;;  %v2777_v17 = vrot.slane %v1722_v30, 2  ;;  %v1017_v28 = vrot.slane %v960_v26, 2 }
  0x4f   : > { %v614_v22 = vsel %vm307_vm1, %v2776_v13, %v613_v50  ;;  %v279_v29 = vmul.f32 %v1636_v2, %v2006_v63  ;;  %v931_v44 = vadd.f32 %v883_v27, %v808_v49  ;;  %v253_v60 = vmul.f32 %v1631_v1, %v1732_v35 }
  0x50   : > { %v737_v38 = vsel %vm431_vm2, %v2777_v17, %v736_v10  ;;  %v497_v39 = vadd.f32 %v456_v56, %v373_v24  ;;  %v403_v20 = vmul.f32 %v1641_v3, %v2006_v63  ;;  %v2778_v50 = vrot.slane %v1743_v40, 1 }
  0x51   : > { %v2779_v10 = vrot.slane %v1749_v43, 2  ;;  %v341_v11 = vrot.slane %v279_v29, 1  ;;  %v562_v56 = vmul.f32 %v1651_v5, %v2028_v41  ;;  %v1054_v24 = vadd.f32 %v1006_v32, %v931_v44 }
  0x52   : > { %v895_v30 = vsel %vm307_vm1, %v2778_v50, %v894_v46  ;;  %v532_v27 = vadd.f32 %v516_v42, %v497_v39  ;;  %v465_v26 = vrot.slane %v403_v20, 2  ;;  %v685_v49 = vmul.f32 %v1661_v6, %v2028_v41 }
  0x53   : > { %v1018_v7 = vsel %vm431_vm2, %v2779_v10, %v1017_v28  ;;  %v2780_v13 = vrot.slane %v1765_v52, 1  ;;  %v520_v43 = vmul.f32 %v1646_v4, %v1768_v54  ;;  %v623_v46 = vrot.slane %v562_v56, 1  ;;  %v200_v28 = vld [vmem:[%s1656_s11 + $0x10] sm:$0x3]  ;;  %1316 = vmatmul.msk.f32.vlgmr.msra.gmra.mxu1 %vm1067_vm3, %v1054_v24  ;;  %v2075_v56 = vld [vmem:[%s1656_s11 + $0x28] sm:$0x3] }
  0x54   : > { %v843_v17 = vmul.f32 %v1693_v16, %v2039_v62  ;;  %v655_v42 = vadd.f32 %v614_v22, %v532_v27  ;;  %v2781_v29 = vrot.slane %v1774_v57, 2  ;;  %v746_v39 = vrot.slane %v685_v49, 2 }
  0x55   : > { %v342_v40 = vsel %vm307_vm1, %v2780_v13, %v341_v11  ;;  %v2782_v52 = vrot.slane %v1799_v19, 1  ;;  %v801_v50 = vmul.f32 %v1688_v15, %v1792_v14  ;;  %v966_v11 = vmul.f32 %v1713_v25, %v2039_v62 }
  0x56   : > { %v377_v32 = vadd.f32 %v342_v40, %v253_v60  ;;  %v466_v44 = vsel %vm431_vm2, %v2781_v29, %v465_v26  ;;  %v904_v10 = vrot.slane %v843_v17, 1  ;;  %v778_v22 = vadd.f32 %v737_v38, %v655_v42 }
  0x57   : > { %v624_v20 = vsel %vm307_vm1, %v2782_v52, %v623_v46  ;;  %v241_v57 = vmul.f32 %v1631_v1, %v1834_v55  ;;  %v261_v24 = vmul.f32 %v1636_v2, %v200_v28  ;;  %v2783_v19 = vrot.slane %v1805_v23, 2 }
  0x58   : > { %v501_v60 = vadd.f32 %v466_v44, %v377_v32  ;;  %v2784_v26 = vrot.slane %v1818_v45, 1  ;;  %v1027_v13 = vrot.slane %v966_v11, 2  ;;  %v385_v40 = vmul.f32 %v1641_v3, %v200_v28 }
  0x59   : > { %v747_v27 = vsel %vm431_vm2, %v2783_v19, %v746_v39  ;;  %v813_v46 = vadd.f32 %v797_v12, %v778_v22  ;;  %v311_v17 = vrot.slane %v261_v24, 1  ;;  %v544_v55 = vmul.f32 %v1651_v5, %v2075_v56  ;;  %v2097_v12 = vld [vmem:[%s1656_s11 + $0x40] sm:$0x3] }
  0x5a   : > { %v905_v49 = vsel %vm307_vm1, %v2784_v26, %v904_v10  ;;  %v536_v38 = vadd.f32 %v520_v43, %v501_v60  ;;  %v2785_v42 = vrot.slane %v1831_v53, 2  ;;  %v435_v23 = vrot.slane %v385_v40, 2 }
  0x5b   : > { %v508_v45 = vmul.f32 %v1646_v4, %v1847_v58  ;;  %v667_v29 = vmul.f32 %v1661_v6, %v2075_v56  ;;  %v936_v44 = vadd.f32 %v895_v30, %v813_v46  ;;  %v2786_v43 = vrot.slane %v1851_v61, 1 }
  0x5c   : > { %v1028_v32 = vsel %vm431_vm2, %v2785_v42, %v1027_v13  ;;  %v659_v28 = vadd.f32 %v624_v20, %v536_v38  ;;  %v593_v52 = vrot.slane %v544_v55, 1  ;;  %v2787_v10 = vrot.slane %v1859_v59, 2  ;;  %v2112_v20 = vld [vmem:[%s1656_s11 + $0x58] sm:$0x3] }
  0x5d   : > { %v312_v39 = vsel %vm307_vm1, %v2786_v43, %v311_v17  ;;  %v716_v22 = vrot.slane %v667_v29, 2  ;;  %v825_v60 = vmul.f32 %v1693_v16, %v2097_v12  ;;  %v1059_v24 = vadd.f32 %v1018_v7, %v936_v44 }
  0x5e   : > { %v365_v53 = vadd.f32 %v312_v39, %v241_v57  ;;  %v436_v11 = vsel %vm431_vm2, %v2787_v10, %v435_v23  ;;  %v782_v19 = vadd.f32 %v747_v27, %v659_v28  ;;  %v789_v30 = vmul.f32 %v1688_v15, %v1889_v48 }
  0x5f   : > { %v948_v61 = vmul.f32 %v1713_v25, %v2097_v12  ;;  %v2788_v57 = vrot.slane %v1870_v47, 1  ;;  %v2789_v13 = vrot.slane %v1879_v21, 2  ;;  %v874_v46 = vrot.slane %v825_v60, 1  ;;  %1321 = vmatmul.msk.f32.gmra.mxu2 %vm1067_vm3, %v1059_v24 }
  0x60   : > { %v489_v26 = vadd.f32 %v436_v11, %v365_v53  ;;  %v817_v7 = vadd.f32 %v801_v50, %v782_v19  ;;  %v267_v38 = vmul.f32 %v1636_v2, %v2097_v12  ;;  %v391_v17 = vmul.f32 %v1641_v3, %v2097_v12 }
  0x61   : > { %v594_v59 = vsel %vm307_vm1, %v2788_v57, %v593_v52  ;;  %v717_v40 = vsel %vm431_vm2, %v2789_v13, %v716_v22  ;;  %v997_v27 = vrot.slane %v948_v61, 2  ;;  %v2790_v47 = vrot.slane %v1898_v0, 1 }
  0x62   : > { %v524_v55 = vadd.f32 %v508_v45, %v489_v26  ;;  %v245_v21 = vmul.f32 %v1631_v1, %v1889_v48  ;;  %v550_v23 = vmul.f32 %v1651_v5, %v2112_v20  ;;  %v940_v29 = vadd.f32 %v905_v49, %v817_v7 }
  0x63   : > { %v875_v42 = vsel %vm307_vm1, %v2790_v47, %v874_v46  ;;  %v321_v50 = vrot.slane %v267_v38, 1  ;;  %v445_v44 = vrot.slane %v391_v17, 2  ;;  %v512_v28 = vmul.f32 %v1646_v4, %v1919_v36  ;;  %v2795_v46 = vld [vmem:[#allocation6_spill] sm:$0xff] }
  0x64   : > { %v647_v43 = vadd.f32 %v594_v59, %v524_v55  ;;  %v2791_v39 = vrot.slane %v1907_v18, 2  ;;  %v603_v0 = vrot.slane %v550_v23, 1  ;;  %v673_v52 = vmul.f32 %v1661_v6, %v2112_v20 }
  0x65   : > { %v1063_v53 = vadd.f32 %v1028_v32, %v940_v29  ;;  %v2792_v10 = vrot.slane %v1925_v33, 1  ;;  %v2793_v49 = vrot.slane %v1936_v31, 2  ;;  %v831_v60 = vmul.f32 %v1693_v16, %v1974_v37 }
  0x66   : > { %v998_v45 = vsel %vm431_vm2, %v2791_v39, %v997_v27  ;;  %v770_v24 = vadd.f32 %v717_v40, %v647_v43  ;;  %v726_v19 = vrot.slane %v673_v52, 2  ;;  %v793_v61 = vmul.f32 %v1688_v15, %v1667_v8  ;;  %v2796_v27 = vld [vmem:[#allocation14_spill] sm:$0xff] }
  0x67   : > { %v322_v11 = vsel %vm307_vm1, %v2792_v10, %v321_v50  ;;  %v446_v22 = vsel %vm431_vm2, %v2793_v49, %v445_v44  ;;  %1325 = vmatmul.msk.f32.gmra.mxu3 %vm1067_vm3, %v1063_v53  ;;  %v2794_v32 = vrot.slane %v1946_v34, 1  ;;  %v884_v26 = vrot.slane %v831_v60, 1  ;;  %v2798_v50 = vld [vmem:[#allocation15_spill] sm:$0xff] }
  0x68   : > { %v369_v18 = vadd.f32 %v322_v11, %v245_v21  ;;  %v954_v31 = vmul.f32 %v1713_v25, %v1974_v37  ;;  %v274_v57 = vmul.f32 %v1636_v2, %v1670_v9  ;;  %v805_v59 = vadd.f32 %v789_v30, %v770_v24 }
  0x69   : > { %v604_v33 = vsel %vm307_vm1, %v2794_v32, %v603_v0  ;;  %v250_v40 = vmul.f32 %v1631_v1, %v1670_v9  ;;  %v2161_v7 = vmul.f32 %v1636_v2, %v2795_v46  ;;  %v2797_v34 = vrot.slane %v2796_v27, 2  ;;  %v2800_v0 = vld [vmem:[#allocation7_spill] sm:$0xff] }
  0x6a   : > { %v493_v13 = vadd.f32 %v446_v22, %v369_v18  ;;  %v1007_v17 = vrot.slane %v954_v31, 2  ;;  %v333_v55 = vrot.slane %v274_v57, 1  ;;  %v398_v47 = vmul.f32 %v1641_v3, %v1670_v9 }
  0x6b   : > { %v727_v38 = vsel %vm431_vm2, %v2797_v34, %v726_v19  ;;  %v928_v21 = vadd.f32 %v875_v42, %v805_v59  ;;  %v2744_v30 = vrot.slane %v2161_v7, 1  ;;  %v2171_v29 = vmul.f32 %v1641_v3, %v2795_v46  ;;  %v2802_v59 = vld [vmem:[#allocation8_spill] sm:$0xff] }
  0x6c   : > { %v528_v23 = vadd.f32 %v512_v28, %v493_v13  ;;  %v2799_v44 = vrot.slane %v2798_v50, 1  ;;  %v457_v39 = vrot.slane %v398_v47, 2  ;;  %v517_v52 = vmul.f32 %v1646_v4, %v2800_v0 }
  0x6d   : > { %v557_v53 = vmul.f32 %v1651_v5, %v2800_v0  ;;  %v1051_v10 = vadd.f32 %v998_v45, %v928_v21  ;;  %v335_v28 = vsel %vm307_vm1, %v333_v55, %v2744_v30  ;;  %v2742_v11 = vrot.slane %v2171_v29, 2 }
  0x6e   : > { %v885_v43 = vsel %vm307_vm1, %v2799_v44, %v884_v26  ;;  %v651_v42 = vadd.f32 %v604_v33, %v528_v23  ;;  %v374_v49 = vadd.f32 %v335_v28, %v250_v40  ;;  %v2186_v22 = vmul.f32 %v1651_v5, %v1732_v35 }
  0x6f   : > { %v615_v60 = vrot.slane %v557_v53, 1  ;;  %v680_v24 = vmul.f32 %v1661_v6, %v2800_v0  ;;  %1313 = vmatmul.msk.f32.gmra.mxu0 %vm1067_vm3, %v1051_v10  ;;  %v2801_v45 = vrot.slane %v1983_v51, 2  ;;  %v459_v32 = vsel %vm431_vm2, %v457_v39, %v2742_v11 }
  0x70   : > { %v774_v18 = vadd.f32 %v727_v38, %v651_v42  ;;  %v2199_v33 = vmul.f32 %v1661_v6, %v1732_v35  ;;  %v498_v26 = vadd.f32 %v459_v32, %v374_v49  ;;  %v2741_v31 = vrot.slane %v2186_v22, 1  ;;  %v2803_v32 = vld [vmem:[#allocation9_spill] sm:$0xff] }
  0x71   : > { %v1008_v19 = vsel %vm431_vm2, %v2801_v45, %v1007_v17  ;;  %v738_v57 = vrot.slane %v680_v24, 2  ;;  %v838_v13 = vmul.f32 %v1693_v16, %v2802_v59  ;;  %v2207_v27 = vmul.f32 %v1693_v16, %v1768_v54 }
  0x72   : > { %v809_v40 = vadd.f32 %v793_v61, %v774_v18  ;;  %v2740_v51 = vrot.slane %v2199_v33, 2  ;;  %v961_v34 = vmul.f32 %v1713_v25, %v2802_v59  ;;  %v533_v38 = vadd.f32 %v517_v52, %v498_v26 }
  0x73   : > { %v617_v17 = vsel %vm307_vm1, %v615_v60, %v2741_v31  ;;  %v896_v55 = vrot.slane %v838_v13, 1  ;;  %v2216_v47 = vmul.f32 %v1713_v25, %v1768_v54  ;;  %v2736_v23 = vrot.slane %v2207_v27, 1  ;;  %v2251_v13 = vld [vmem:[%s1656_s11 + $0xe0] sm:$0xff] }
  0x74   : > { %v932_v61 = vadd.f32 %v885_v43, %v809_v40  ;;  %v740_v21 = vsel %vm431_vm2, %v738_v57, %v2740_v51  ;;  %v1019_v50 = vrot.slane %v961_v34, 2  ;;  %v656_v44 = vadd.f32 %v617_v17, %v533_v38 }
  0x75   : > { %v798_v39 = vmul.f32 %v1688_v15, %v2802_v59  ;;  %v2733_v0 = vrot.slane %v2216_v47, 2  ;;  %v280_v52 = vmul.f32 %v1636_v2, %v2802_v59  ;;  %v254_v43 = vmul.f32 %v1631_v1, %v2802_v59 }
  0x76   : > { %v1055_v53 = vadd.f32 %v1008_v19, %v932_v61  ;;  %v2231_v10 = vmul.f32 %v1636_v2, %v1768_v54  ;;  %v404_v42 = vmul.f32 %v1641_v3, %v2802_v59  ;;  %v779_v28 = vadd.f32 %v740_v21, %v656_v44  ;;  %v225_v59 = vld [vmem:[%s1656_s11 + $0xd8] sm:$0xff] }
  0x77   : > { %v898_v49 = vsel %vm307_vm1, %v896_v55, %v2736_v23  ;;  %v343_v60 = vrot.slane %v280_v52, 1  ;;  %v2240_v24 = vmul.f32 %v1641_v3, %v1768_v54  ;;  %v1021_v18 = vsel %vm431_vm2, %v1019_v50, %v2733_v0  ;;  %v2805_v23 = vld [vmem:[#allocation11_spill] sm:$0xff] }
  0x78   : > { %1317 = vmatmul.msk.f32.gmra.mxu1 %vm1067_vm3, %v1055_v53  ;;  %v2738_v45 = vrot.slane %v2231_v10, 1  ;;  %v467_v19 = vrot.slane %v404_v42, 2  ;;  %v563_v26 = vmul.f32 %v1651_v5, %v2803_v32  ;;  %v814_v57 = vadd.f32 %v798_v39, %v779_v28 }
  0x79   : > { %v2737_v40 = vrot.slane %v2240_v24, 2  ;;  %v2256_v34 = vmul.f32 %v1651_v5, %v1792_v14  ;;  %v686_v38 = vmul.f32 %v1661_v6, %v2803_v32  ;;  %v521_v55 = vmul.f32 %v1646_v4, %v2803_v32 }
  0x7a   : > { %v345_v17 = vsel %vm307_vm1, %v343_v60, %v2738_v45  ;;  %v625_v61 = vrot.slane %v563_v26, 1  ;;  %v2267_v21 = vmul.f32 %v1661_v6, %v1792_v14  ;;  %v937_v50 = vadd.f32 %v898_v49, %v814_v57 }
  0x7b   : > { %v378_v44 = vadd.f32 %v345_v17, %v254_v43  ;;  %v469_v39 = vsel %vm431_vm2, %v467_v19, %v2737_v40  ;;  %v2735_v52 = vrot.slane %v2256_v34, 1  ;;  %v748_v53 = vrot.slane %v686_v38, 2 }
  0x7c   : > { %v2734_v42 = vrot.slane %v2267_v21, 2  ;;  %v844_v28 = vmul.f32 %v1693_v16, %v225_v59  ;;  %v2277_v60 = vmul.f32 %v1693_v16, %v2251_v13  ;;  %v1060_v32 = vadd.f32 %v1021_v18, %v937_v50 }
  0x7d   : > { %v502_v26 = vadd.f32 %v469_v39, %v378_v44  ;;  %v802_v49 = vmul.f32 %v1688_v15, %v225_v59  ;;  %v967_v43 = vmul.f32 %v1713_v25, %v225_v59  ;;  %v627_v19 = vsel %vm307_vm1, %v625_v61, %v2735_v52  ;;  %v2804_v59 = vld [vmem:[#allocation10_spill] sm:$0xff] }
  0x7e   : > { %v906_v57 = vrot.slane %v844_v28, 1  ;;  %v2739_v38 = vrot.slane %v2277_v60, 1  ;;  %v2287_v17 = vmul.f32 %v1713_v25, %v2251_v13  ;;  %1322 = vmatmul.msk.f32.gmra.mxu2 %vm1067_vm3, %v1060_v32  ;;  %v750_v18 = vsel %vm431_vm2, %v748_v53, %v2734_v42 }
  0x7f   : > { %v537_v0 = vadd.f32 %v521_v55, %v502_v26  ;;  %v1029_v50 = vrot.slane %v967_v43, 2  ;;  %v262_v44 = vmul.f32 %v1636_v2, %v2804_v59  ;;  %v242_v39 = vmul.f32 %v1631_v1, %v2804_v59 }
  0x80   : > { %v2743_v61 = vrot.slane %v2287_v17, 2  ;;  %v2300_v28 = vmul.f32 %v1636_v2, %v1847_v58  ;;  %v386_v55 = vmul.f32 %v1641_v3, %v2804_v59  ;;  %v908_v53 = vsel %vm307_vm1, %v906_v57, %v2739_v38 }
  0x81   : > { %v660_v32 = vadd.f32 %v627_v19, %v537_v0  ;;  %v313_v26 = vrot.slane %v262_v44, 1  ;;  %v2309_v43 = vmul.f32 %v1641_v3, %v1847_v58  ;;  %v509_v40 = vmul.f32 %v1646_v4, %v2805_v23 }
  0x82   : > { %v2745_v42 = vrot.slane %v2300_v28, 1  ;;  %v437_v52 = vrot.slane %v386_v55, 2  ;;  %v545_v45 = vmul.f32 %v1651_v5, %v2805_v23  ;;  %v2319_v19 = vmul.f32 %v1651_v5, %v1889_v48 }
  0x83   : > { %v783_v59 = vadd.f32 %v750_v18, %v660_v32  ;;  %v2746_v0 = vrot.slane %v2309_v43, 2  ;;  %v668_v57 = vmul.f32 %v1661_v6, %v2805_v23  ;;  %v1031_v44 = vsel %vm431_vm2, %v1029_v50, %v2743_v61  ;;  %v2807_v61 = vld [vmem:[#allocation12_spill] sm:$0xff] }
  0x84   : > { %v315_v55 = vsel %vm307_vm1, %v313_v26, %v2745_v42  ;;  %v595_v38 = vrot.slane %v545_v45, 1  ;;  %v2331_v18 = vmul.f32 %v1661_v6, %v1889_v48  ;;  %v2747_v23 = vrot.slane %v2319_v19, 1 }
  0x85   : > { %v818_v32 = vadd.f32 %v802_v49, %v783_v59  ;;  %v366_v51 = vadd.f32 %v315_v55, %v242_v39  ;;  %v439_v31 = vsel %vm431_vm2, %v437_v52, %v2746_v0  ;;  %v718_v11 = vrot.slane %v668_v57, 2 }
  0x86   : > { %2806 = vst [vmem:[#allocation6_spill] sm:$0xff] %v2331_v18  ;;  %v2749_v50 = vrot.slane %v2331_v18, 2  ;;  %v826_v30 = vmul.f32 %v1693_v16, %v2807_v61  ;;  %v2342_v45 = vmul.f32 %v1693_v16, %v1919_v36  ;;  %v790_v49 = vmul.f32 %v1688_v15, %v2807_v61 }
  0x87   : > { %v941_v26 = vadd.f32 %v908_v53, %v818_v32  ;;  %v490_v42 = vadd.f32 %v439_v31, %v366_v51  ;;  %v949_v52 = vmul.f32 %v1713_v25, %v2807_v61  ;;  %v597_v39 = vsel %vm307_vm1, %v595_v38, %v2747_v23 }
  0x88   : > { %2808 = vst [vmem:[#allocation14_spill] sm:$0xff] %v2342_v45  ;;  %v876_v59 = vrot.slane %v826_v30, 1  ;;  %v2748_v57 = vrot.slane %v2342_v45, 1  ;;  %v2354_v55 = vmul.f32 %v1713_v25, %v1919_v36  ;;  %v720_v31 = vsel %vm431_vm2, %v718_v11, %v2749_v50 }
  0x89   : > { %v1064_v0 = vadd.f32 %v1031_v44, %v941_v26  ;;  %v525_v53 = vadd.f32 %v509_v40, %v490_v42  ;;  %v999_v51 = vrot.slane %v949_v52, 2  ;;  %v246_v30 = vmul.f32 %v1631_v1, %v2807_v61 }
  0x8a   : > { %v878_v32 = vsel %vm307_vm1, %v876_v59, %v2748_v57  ;;  %v268_v38 = vmul.f32 %v1636_v2, %v2807_v61  ;;  %v2368_v23 = vmul.f32 %v1636_v2, %v1919_v36  ;;  %v392_v42 = vmul.f32 %v1641_v3, %v2807_v61  ;;  %v2810_v59 = vld [vmem:[#allocation5_spill] sm:$0xff] }
  0x8b   : > { %1326 = vmatmul.msk.f32.gmra.mxu3 %vm1067_vm3, %v1064_v0  ;;  %v648_v40 = vadd.f32 %v597_v39, %v525_v53  ;;  %v2376_v44 = vmul.f32 %v1641_v3, %v1919_v36  ;;  %v513_v57 = vmul.f32 %v1646_v4, %v2810_v59  ;;  %v551_v50 = vmul.f32 %v1651_v5, %v2810_v59 }
  0x8c   : > { %2809 = vst [vmem:[#allocation15_spill] sm:$0xff] %v2368_v23  ;;  %v323_v26 = vrot.slane %v268_v38, 1  ;;  %v2756_v52 = vrot.slane %v2368_v23, 1  ;;  %v447_v39 = vrot.slane %v392_v42, 2  ;;  %v2386_v61 = vmul.f32 %v1651_v5, %v1667_v8 }
  0x8d   : > { %v771_v0 = vadd.f32 %v720_v31, %v648_v40  ;;  %v448_v53 = vrot.slane %v2376_v44, 2  ;;  %v605_v11 = vrot.slane %v551_v50, 1  ;;  %v674_v45 = vmul.f32 %v1661_v6, %v2810_v59 }
  0x8e   : > { %v325_v38 = vsel %vm307_vm1, %v323_v26, %v2756_v52  ;;  %v2395_v37 = vmul.f32 %v1661_v6, %v1667_v8  ;;  %v606_v36 = vrot.slane %v2386_v61, 1  ;;  %v2811_v23 = vrot.slane %v2354_v55, 2 }
  0x8f   : > { %v806_v31 = vadd.f32 %v790_v49, %v771_v0  ;;  %v370_v40 = vadd.f32 %v325_v38, %v246_v30  ;;  %v449_v42 = vsel %vm431_vm2, %v447_v39, %v448_v53  ;;  %v728_v50 = vrot.slane %v674_v45, 2 }
  0x90   : > { %v1001_v26 = vsel %vm431_vm2, %v999_v51, %v2811_v23  ;;  %v729_v52 = vrot.slane %v2395_v37, 2  ;;  %v832_v59 = vmul.f32 %v1693_v16, %v1670_v9  ;;  %v2409_v49 = vmul.f32 %v1693_v16, %v2795_v46 }
  0x91   : > { %v929_v8 = vadd.f32 %v878_v32, %v806_v31  ;;  %v494_v18 = vadd.f32 %v449_v42, %v370_v40  ;;  %v607_v30 = vsel %vm307_vm1, %v605_v11, %v606_v36  ;;  %v794_v0 = vmul.f32 %v1688_v15, %v1670_v9  ;;  %v2812_v40 = vld [vmem:[#allocation17_spill] sm:$0xff] }
  0x92   : > { %v955_v23 = vmul.f32 %v1713_v25, %v1670_v9  ;;  %v2420_v45 = vmul.f32 %v1713_v25, %v2795_v46  ;;  %v886_v39 = vrot.slane %v832_v59, 1  ;;  %v887_v38 = vrot.slane %v2409_v49, 1 }
  0x93   : > { %v1052_v51 = vadd.f32 %v1001_v26, %v929_v8  ;;  %v529_v32 = vadd.f32 %v513_v57, %v494_v18  ;;  %v730_v31 = vsel %vm431_vm2, %v728_v50, %v729_v52  ;;  %v251_v11 = vmul.f32 %v1631_v1, %v2795_v46 }
  0x94   : > { %v276_v42 = vmul.f32 %v1636_v2, %v2812_v40  ;;  %v400_v9 = vmul.f32 %v1641_v3, %v2812_v40  ;;  %v1009_v18 = vrot.slane %v955_v23, 2  ;;  %v1010_v57 = vrot.slane %v2420_v45, 2 }
  0x95   : > { %1314 = vmatmul.msk.f32.gmra.mxu0 %vm1067_vm3, %v1052_v51  ;;  %v652_v26 = vadd.f32 %v607_v30, %v529_v32  ;;  %v559_v59 = vmul.f32 %v1651_v5, %v2006_v63  ;;  %v682_v1 = vmul.f32 %v1661_v6, %v2006_v63  ;;  %v888_v2 = vsel %vm307_vm1, %v886_v39, %v887_v38 }
  0x96   : > { %v336_v8 = vrot.slane %v276_v42, 1  ;;  %v460_v50 = vrot.slane %v400_v9, 2  ;;  %v2813_v51 = vrot.slane %v2161_v7, 1  ;;  %v2814_v23 = vrot.slane %v2171_v29, 2 }
  0x97   : > { %v775_v46 = vadd.f32 %v730_v31, %v652_v26  ;;  %v618_v3 = vrot.slane %v559_v59, 1  ;;  %v840_v32 = vmul.f32 %v1693_v16, %v2028_v41  ;;  %v963_v6 = vmul.f32 %v1713_v25, %v2028_v41 }
  0x98   : > { %v337_v30 = vsel %vm307_vm1, %v2813_v51, %v336_v8  ;;  %v461_v5 = vsel %vm431_vm2, %v2814_v23, %v460_v50  ;;  %v1011_v39 = vsel %vm431_vm2, %v1009_v18, %v1010_v57  ;;  %v518_v7 = vmul.f32 %v1646_v4, %v1732_v35  ;;  %v227_v8 = vld [vmem:[%s1656_s11 + $0xe8] sm:$0x3]  ;;  %v2472_v4 = vld [vmem:[%s2687_s1] ss:$0 sm:$0xff]  ;;  %v2493_v23 = vld [vmem:[%s2687_s1 + $0x5] ss:$0 sm:$0xff] }
  0x99   : > { %v810_v63 = vadd.f32 %v794_v0, %v775_v46  ;;  %v375_v31 = vadd.f32 %v337_v30, %v251_v11  ;;  %v2815_v42 = vrot.slane %v2186_v22, 1  ;;  %v741_v9 = vrot.slane %v682_v1, 2  ;;  %v2464_v0 = vld [vmem:[%s2687_s1 + $0x1] ss:$0 sm:$0xff] }
  0x9a   : > { %v799_v26 = vmul.f32 %v1688_v15, %v1768_v54  ;;  %v282_v18 = vmul.f32 %v2464_v0, %v2028_v41  ;;  %v255_v35 = vmul.f32 %v2472_v4, %v1768_v54  ;;  %v2479_v15 = vld [vmem:[%s2687_s1 + $0x2] ss:$0 sm:$0xff]  ;;  %v899_v50 = vrot.slane %v840_v32, 1 }
  0x9b   : > { %v619_v29 = vsel %vm307_vm1, %v2815_v42, %v618_v3  ;;  %v933_v11 = vadd.f32 %v888_v2, %v810_v63  ;;  %v499_v59 = vadd.f32 %v461_v5, %v375_v31  ;;  %v406_v22 = vmul.f32 %v2479_v15, %v2028_v41  ;;  %v2486_v2 = vld [vmem:[%s2687_s1 + $0x4] ss:$0 sm:$0xff] }
  0x9c   : > { %v1022_v1 = vrot.slane %v963_v6, 2  ;;  %v346_v46 = vrot.slane %v282_v18, 1  ;;  %v565_v3 = vmul.f32 %v2486_v2, %v2039_v62  ;;  %v688_v41 = vmul.f32 %v2493_v23, %v2039_v62  ;;  %v2511_v62 = vld [vmem:[%s2687_s1 + $0x3] ss:$0 sm:$0xff] }
  0x9d   : > { %v1056_v54 = vadd.f32 %v1011_v39, %v933_v11  ;;  %v534_v51 = vadd.f32 %v518_v7, %v499_v59  ;;  %v470_v30 = vrot.slane %v406_v22, 2  ;;  %v2816_v5 = vrot.slane %v2199_v33, 2 }
  0x9e   : > { %v2817_v6 = vrot.slane %v2231_v10, 1  ;;  %v628_v31 = vrot.slane %v565_v3, 1  ;;  %v846_v39 = vmul.f32 %v1693_v16, %v227_v8  ;;  %v2818_v18 = vrot.slane %v2240_v24, 2 }
  0x9f   : > { %v742_v32 = vsel %vm431_vm2, %v2816_v5, %v741_v9  ;;  %1318 = vmatmul.msk.f32.gmra.mxu1 %vm1067_vm3, %v1056_v54  ;;  %v657_v7 = vadd.f32 %v619_v29, %v534_v51  ;;  %v522_v33 = vmul.f32 %v2511_v62, %v1792_v14  ;;  %v2819_v10 = vrot.slane %v2207_v27, 1 }
  0xa0   : > { %v347_v63 = vsel %vm307_vm1, %v2817_v6, %v346_v46  ;;  %v471_v11 = vsel %vm431_vm2, %v2818_v18, %v470_v30  ;;  %v2820_v9 = vrot.slane %v2216_v47, 2  ;;  %v751_v59 = vrot.slane %v688_v41, 2  ;;  %v2525_v46 = vld [vmem:[%s2687_s1 + $0x6] ss:$0 sm:$0xff] }
  0xa1   : > { %v379_v42 = vadd.f32 %v347_v63, %v255_v35  ;;  %v900_v16 = vsel %vm307_vm1, %v2819_v10, %v899_v50  ;;  %v969_v24 = vmul.f32 %v1713_v25, %v227_v8  ;;  %v780_v35 = vadd.f32 %v742_v32, %v657_v7 }
  0xa2   : > { %v1023_v29 = vsel %vm431_vm2, %v2820_v9, %v1022_v1  ;;  %v803_v14 = vmul.f32 %v2525_v46, %v2251_v13  ;;  %v264_v27 = vmul.f32 %v2464_v0, %v2075_v56  ;;  %v2821_v47 = vrot.slane %v2256_v34, 1 }
  0xa3   : > { %v503_v22 = vadd.f32 %v471_v11, %v379_v42  ;;  %v909_v1 = vrot.slane %v846_v39, 1  ;;  %v243_v25 = vmul.f32 %v2472_v4, %v1847_v58  ;;  %v388_v8 = vmul.f32 %v2479_v15, %v2075_v56 }
  0xa4   : > { %v629_v50 = vsel %vm307_vm1, %v2821_v47, %v628_v31  ;;  %v815_v3 = vadd.f32 %v799_v26, %v780_v35  ;;  %v316_v51 = vrot.slane %v264_v27, 1  ;;  %v547_v13 = vmul.f32 %v2486_v2, %v2097_v12  ;;  %v2828_v27 = vld [vmem:[#allocation6_spill] sm:$0xff] }
  0xa5   : > { %v538_v54 = vadd.f32 %v522_v33, %v503_v22  ;;  %v2822_v30 = vrot.slane %v2267_v21, 2  ;;  %v1032_v34 = vrot.slane %v969_v24, 2  ;;  %v440_v5 = vrot.slane %v388_v8, 2  ;;  %v2831_v8 = vld [vmem:[#allocation16_spill] sm:$0xff] }
  0xa6   : > { %v670_v32 = vmul.f32 %v2493_v23, %v2097_v12  ;;  %v938_v6 = vadd.f32 %v900_v16, %v815_v3  ;;  %v2823_v63 = vrot.slane %v2300_v28, 1  ;;  %v598_v26 = vrot.slane %v547_v13, 1  ;;  %v1428_v12 = vld [vmem:[%s2687_s1 + $0x7] ss:$0 sm:$0xff] }
  0xa7   : > { %v752_v41 = vsel %vm431_vm2, %v2822_v30, %v751_v59  ;;  %v661_v58 = vadd.f32 %v629_v50, %v538_v54  ;;  %v2824_v39 = vrot.slane %v2309_v43, 2  ;;  %v510_v21 = vmul.f32 %v2511_v62, %v1889_v48  ;;  %v1429_v48 = vld [vmem:[%s2687_s1 + $0x8] ss:$0 sm:$0xff] }
  0xa8   : > { %v317_v56 = vsel %vm307_vm1, %v2823_v63, %v316_v51  ;;  %v721_v42 = vrot.slane %v670_v32, 2  ;;  %v1061_v18 = vadd.f32 %v1023_v29, %v938_v6  ;;  %v828_v28 = vmul.f32 %v1428_v12, %v2112_v20 }
  0xa9   : > { %v367_v31 = vadd.f32 %v317_v56, %v243_v25  ;;  %v441_v7 = vsel %vm431_vm2, %v2824_v39, %v440_v5  ;;  %v784_v11 = vadd.f32 %v752_v41, %v661_v58  ;;  %v2825_v33 = vrot.slane %v2277_v60, 1  ;;  %v2832_v41 = vld [vmem:[#allocation15_spill] sm:$0xff]  ;;  %v1430_v58 = vld [vmem:[%s1656_s11 + $0x68] sm:$0xff] }
  0xaa   : > { %v2826_v43 = vrot.slane %v2287_v17, 2  ;;  %v951_v29 = vmul.f32 %v1429_v48, %v2112_v20  ;;  %1323 = vmatmul.msk.f32.gmra.mxu2 %vm1067_vm3, %v1061_v18  ;;  %v2827_v24 = vrot.slane %v2319_v19, 1  ;;  %v270_v35 = vmul.f32 %v2464_v0, %v2112_v20  ;;  %v2834_v56 = vld [vmem:[#allocation14_spill] sm:$0xff] }
  0xab   : > { %v910_v10 = vsel %vm307_vm1, %v2825_v33, %v909_v1  ;;  %v491_v9 = vadd.f32 %v441_v7, %v367_v31  ;;  %v819_v59 = vadd.f32 %v803_v14, %v784_v11  ;;  %v394_v17 = vmul.f32 %v2479_v15, %v2112_v20  ;;  %v2830_v1 = vld [vmem:[#allocation13_spill] sm:$0xff] }
  0xac   : > { %v1033_v16 = vsel %vm431_vm2, %v2826_v43, %v1032_v34  ;;  %v599_v60 = vsel %vm307_vm1, %v2827_v24, %v598_v26  ;;  %v2829_v47 = vrot.slane %v2828_v27, 2  ;;  %v247_v25 = vmul.f32 %v2472_v4, %v2830_v1 }
  0xad   : > { %v526_v22 = vadd.f32 %v510_v21, %v491_v9  ;;  %v553_v19 = vmul.f32 %v2486_v2, %v2831_v8  ;;  %v942_v14 = vadd.f32 %v910_v10, %v819_v59  ;;  %v879_v3 = vrot.slane %v828_v28, 1 }
  0xae   : > { %v722_v50 = vsel %vm431_vm2, %v2829_v47, %v721_v42  ;;  %v326_v54 = vrot.slane %v270_v35, 1  ;;  %v450_v51 = vrot.slane %v394_v17, 2  ;;  %v791_v20 = vmul.f32 %v2525_v46, %v2830_v1 }
  0xaf   : > { %v649_v0 = vadd.f32 %v599_v60, %v526_v22  ;;  %v1002_v15 = vrot.slane %v951_v29, 2  ;;  %v676_v13 = vmul.f32 %v2493_v23, %v2831_v8  ;;  %v1065_v30 = vadd.f32 %v1033_v16, %v942_v14 }
  0xb0   : > { %v2833_v34 = vrot.slane %v2832_v41, 1  ;;  %v451_v2 = vsel %vm431_vm2, %v448_v53, %v450_v51  ;;  %v608_v5 = vrot.slane %v553_v19, 1  ;;  %v514_v63 = vmul.f32 %v1430_v58, %v2511_v62 }
  0xb1   : > { %v772_v32 = vadd.f32 %v722_v50, %v649_v0  ;;  %1327 = vmatmul.msk.f32.gmra.mxu3 %vm1067_vm3, %v1065_v30  ;;  %v2835_v23 = vrot.slane %v2834_v56, 1  ;;  %v731_v31 = vrot.slane %v676_v13, 2  ;;  %v834_v39 = vmul.f32 %v1428_v12, %v2812_v40 }
  0xb2   : > { %v327_v4 = vsel %vm307_vm1, %v2833_v34, %v326_v54  ;;  %v2836_v53 = vrot.slane %v2354_v55, 2  ;;  %v609_v62 = vsel %vm307_vm1, %v606_v36, %v608_v5  ;;  %v957_v42 = vmul.f32 %v1429_v48, %v2812_v40  ;;  %v1431_v55 = vld [vmem:[%s1656_s11 + $0x80] sm:$0xff]  ;;  %s2622_s11 = scalar_lea.vmem [#allocation2], %s1309_s21 }
  0xb3   : > { %v371_v6 = vadd.f32 %v327_v4, %v247_v25  ;;  %v880_v26 = vsel %vm307_vm1, %v2835_v23, %v879_v3  ;;  %v807_v7 = vadd.f32 %v791_v20, %v772_v32  ;;  %v732_v12 = vsel %vm431_vm2, %v729_v52, %v731_v31  ;;  %s1216_s6 = sshll.u32 %s2622_s11, 4  ;;  %s1217_s6 = int_to_ptr.vmem [resolvable:$true] %s1216_s6 }
  0xb4   : > { %v1003_v21 = vsel %vm431_vm2, %v2836_v53, %v1002_v15  ;;  %v889_v28 = vrot.slane %v834_v39, 1  ;;  %v795_v43 = vmul.f32 %v1431_v55, %v2525_v46  ;;  %v1012_v16 = vrot.slane %v957_v42, 2 }
  0xb5   : > { %v495_v44 = vadd.f32 %v451_v2, %v371_v6  ;;  %v930_v18 = vadd.f32 %v880_v26, %v807_v7 }
  0xb6   : > { %v890_v36 = vsel %vm307_vm1, %v887_v38, %v889_v28  ;;  %v1013_v37 = vsel %vm431_vm2, %v1010_v57, %v1012_v16 }
  0xb7   : > { %v530_v11 = vadd.f32 %v514_v63, %v495_v44  ;;  %v1053_v33 = vadd.f32 %v1003_v21, %v930_v18 }
  0xb9   : > { %v653_v10 = vadd.f32 %v609_v62, %v530_v11  ;;  %1315 = vmatmul.msk.f32.gmra.mxu0 %vm1067_vm3, %v1053_v33  ;;  %v1161_v46 = vpop.f32.mrf.mxu2 }
  0xba   : > { %1193 = vst [vmem:[%s2622_s11 + $0x40] sm:$0xff] %v1161_v46 }
  0xbb   : > { %v776_v61 = vadd.f32 %v732_v12, %v653_v10 }
  0xbd   : > { %v811_v40 = vadd.f32 %v795_v43, %v776_v61 }
  0xbf   : > { %v934_v52 = vadd.f32 %v890_v36, %v811_v40 }
  0xc1   : > { %v1057_v9 = vadd.f32 %v1013_v37, %v934_v52  ;;  %v1173_v49 = vpop.f32.mrf.mxu3 }
  0xc2   : > { %1197 = vst [vmem:[%s2622_s11 + $0x60] sm:$0xff] %v1173_v49 }
  0xc3   : > { %1319 = vmatmul.msk.f32.gmra.mxu1 %vm1067_vm3, %v1057_v9 }
  0xc6   : > { %v1137_v45 = vpop.f32.mrf.mxu0 }
  0xc7   : > { %1185 = vst [vmem:[%s2622_s11] sm:$0xff] %v1137_v45 }
  0xd0   : > { %v1149_v38 = vpop.f32.mrf.mxu1 }
  0xd1   : > { %1189 = vst [vmem:[%s2622_s11 + $0x20] sm:$0xff] %v1149_v38 }
  0xe2   : > { %v1164_v57 = vpop.f32.mrf.mxu2 }
  0xe3   : > { %1194 = vst [vmem:[%s2622_s11 + $0x48] sm:$0xff] %v1164_v57 }
  0xea   : > { %v1176_v48 = vpop.f32.mrf.mxu3 }
  0xeb   : > { %1198 = vst [vmem:[%s2622_s11 + $0x68] sm:$0xff] %v1176_v48 }
  0xec   : > { %v1140_v29 = vpop.f32.mrf.mxu0 }
  0xed   : > { %1186 = vst [vmem:[%s2622_s11 + $0x8] sm:$0xff] %v1140_v29 }
  0xf5   : > { %v1152_v59 = vpop.f32.mrf.mxu1 }
  0xf6   : > { %1190 = vst [vmem:[%s2622_s11 + $0x28] sm:$0xff] %v1152_v59 }
 0x101   : > { %v1167_v24 = vpop.f32.mrf.mxu2 }
 0x102   : > { %1195 = vst [vmem:[%s2622_s11 + $0x50] sm:$0xff] %v1167_v24 }
 0x10e   : > { %v1179_v60 = vpop.f32.mrf.mxu3 }
 0x10f   : > { %1199 = vst [vmem:[%s2622_s11 + $0x70] sm:$0xff] %v1179_v60 }
 0x112   : > { %v1143_v35 = vpop.f32.mrf.mxu0 }
 0x113   : > { %1187 = vst [vmem:[%s2622_s11 + $0x10] sm:$0xff] %v1143_v35 }
 0x11c   : > { %v1155_v17 = vpop.f32.mrf.mxu1 }
 0x11d   : > { %1191 = vst [vmem:[%s2622_s11 + $0x30] sm:$0xff] %v1155_v17 }
 0x12d   : > { %v1170_v22 = vpop.f32.mrf.mxu2 }
 0x12e   : > { %1196 = vst [vmem:[%s2622_s11 + $0x58] sm:$0xff] %v1170_v22 }
 0x134   : > { %v1182_v27 = vpop.f32.mrf.mxu3 }
 0x135   : > { %1200 = vst [vmem:[%s2622_s11 + $0x78] sm:$0xff] %v1182_v27 }
 0x136   : > { %v1146_v47 = vpop.f32.mrf.mxu0 }
 0x137   : > { %1188 = vst [vmem:[%s2622_s11 + $0x18] sm:$0xff] %v1146_v47 }
 0x140   : > { %v1158_v50 = vpop.f32.mrf.mxu1 }
 0x141   : > { %1192 = vst [vmem:[%s2622_s11 + $0x38] sm:$0xff] %v1158_v50 }
 0x142   : > { %1459 = shalt.err (!%p1456_p7)
}
 0x143   : > { %s1528_s20 = smov 128   ;;  %s1529_s11 = smov 8  }
 0x144   : > { %1339 = dma.vmem_to_hbm [thread:$0]  (%p1601_p3), %s1217_s6, 2048, %s1219_s7, %s1202_s15, %s1528_s20, %s1528_s20, %s1529_s11  }
 0x145 PF: > { %p1345_p9 = scmp.ge.s32.totalorder %s1526_s19, 2  ;;  %s1233_s28 = sand.u32 1, %s1498_s12  }
 0x146   : > { %s1234_s29 = scalar_lea.sflag [#allocation3], %s1233_s28 }
 0x147   : > { %p1342_p10 = pnand %p1345_p9, %p1610_p8 }
 0x149   : > { %p1343_p11 = pneg %p1342_p10 }
 0x14b   : > { %1493 = dma.done.wait (%p1343_p11), %s1234_s29, 2048  }
 0x14c   : > { %1495 = vsyncadd (%p1343_p11), %s1234_s29, 4294965248  ;;  %s16_s19 = sadd.s32 1, %s1526_s19   ;;  %s2837_s12 = smov %s1502_s13 }
 0x14d   : > { %p13_p12 = scmp.ge.s32.totalorder %s16_s19, 6   ;;  %s2838_s13 = smov %s1506_s14 }
 0x14e   : > { %s2839_s14 = smov %s1619_s30  ;;  %s2840_s15 = smov %s1518_s17 }
 0x14f   : > { %s2841_s16 = smov %s1522_s18  ;;  %s2842_s17 = smov %s2845_s22 }
 0x150   : > { %s2843_s18 = smov %s2849_s23  ;;  %15 = sbr.rel (!%p13_p12) target bundleno = 5 (0x5), region = 67 }
 0x155   :  { %1240 = vsyncpa [#allocation3], 1 }
 0x156   :  { %1242 = vsyncpa [#allocation3 + $0x1], 1 }

</bundles_post_ra>
